<compile_context>
chip_gen: v5e
topology: v5e:2x2
jax: 0.10.0
libtpu: 0.0.40
codegen_flags: <defaults>
</compile_context>

<pallas_src>
import functools

import jax
import jax.numpy as jnp
from jax.experimental import pallas as pl
from jax.experimental.pallas import tpu as pltpu


def _round_up(n: int, m: int) -> int:
    return ((n + m - 1) // m) * m


def actor_kernel(x_ref, w1_ref, b1_ref, w2_ref, b2_ref, w3_ref, b3_ref, o_ref,
                 *, compute_dtype):
    """One batch-tile of the actor forward pass. Matmul operands in compute_dtype,
    accumulation and all elementwise math (tanh / softmax) in f32."""
    x = x_ref[...]

    # fc1 + tanh
    h = jnp.tanh(
        jnp.dot(x, w1_ref[...], preferred_element_type=jnp.float32) + b1_ref[...]
    )
    # fc2 + tanh (applied twice, matching the reference forward)
    h = jnp.tanh(
        jnp.dot(h.astype(compute_dtype), w2_ref[...],
                preferred_element_type=jnp.float32) + b2_ref[...]
    )
    h = jnp.tanh(
        jnp.dot(h.astype(compute_dtype), w2_ref[...],
                preferred_element_type=jnp.float32) + b2_ref[...]
    )
    # fc3 + softmax over the (compact) action dim.
    logits = (
        jnp.dot(h.astype(compute_dtype), w3_ref[...],
                preferred_element_type=jnp.float32) + b3_ref[...]
    )
    m = jnp.max(logits, axis=-1, keepdims=True)
    e = jnp.exp(logits - m)
    s = jnp.sum(e, axis=-1, keepdims=True)
    # approx reciprocal -> EUP slot (free); rows sum to 1 within ~1e-3.
    o_ref[...] = (e * pl.reciprocal(s, approx=True)).astype(o_ref.dtype)


def actor_forward(x, w1, b1, w2, b2, w3, b3, *,
                  block_batch=4096, compute_dtype=jnp.float32):
    """x: (batch, input_size) f32.  Weights are (in, out), biases (out,) or (1, out)."""
    batch, input_size = x.shape
    hidden_size = w1.shape[1]
    action_size = w3.shape[1]

    # --- batch tiling ---------------------------------------------------------
    # Tile is a multiple of 8 (f32 sublane). No padding of x and no slicing of
    # the output: the ragged last tile is handled by Pallas (clipped reads,
    # discarded out-of-bounds writes).
    tb = min(block_batch, _round_up(batch, 8))
    # Ensure >= 2 grid steps when the batch can be split, so the "parallel"
    # batch axis actually uses both TensorCores on v7x.
    half = _round_up(pl.cdiv(batch, 2), 8)
    if half < tb:
        tb = half
    grid = (pl.cdiv(batch, tb),)

    # Matmul operands in compute_dtype (bf16 halves the x stream and keeps the
    # MXU on its fast path on v5e/v6e/v7x); biases + elementwise stay f32.
    xb = x.astype(compute_dtype)
    w1c = w1.astype(compute_dtype)
    w2c = w2.astype(compute_dtype)
    w3c = w3.astype(compute_dtype)
    b1r = jnp.reshape(b1, (1, -1)).astype(jnp.float32)
    b2r = jnp.reshape(b2, (1, -1)).astype(jnp.float32)
    b3r = jnp.reshape(b3, (1, -1)).astype(jnp.float32)

    resident = lambda i: (0, 0)   # weights/biases stay VMEM-resident across the grid

    kernel = functools.partial(actor_kernel, compute_dtype=compute_dtype)

    out = pl.pallas_call(
        kernel,
        out_shape=jax.ShapeDtypeStruct((batch, action_size), jnp.float32),
        grid=grid,
        in_specs=[
            pl.BlockSpec((tb, input_size), lambda i: (i, 0)),          # x (streamed)
            pl.BlockSpec((input_size, hidden_size), resident),         # W1
            pl.BlockSpec((1, hidden_size), resident),                  # b1
            pl.BlockSpec((hidden_size, hidden_size), resident),        # W2
            pl.BlockSpec((1, hidden_size), resident),                  # b2
            pl.BlockSpec((hidden_size, action_size), resident),        # W3 (compact)
            pl.BlockSpec((1, action_size), resident),                  # b3 (compact)
        ],
        out_specs=pl.BlockSpec((tb, action_size), lambda i: (i, 0)),   # compact store
        compiler_params=pltpu.CompilerParams(
            dimension_semantics=("parallel",)),                        # 2 TCs on v7x
    )(xb, w1c, b1r, w2c, b2r, w3c, b3r)

    return out


def init_params(key, input_size, hidden_size, action_size):
    """Deterministic synthetic init (uniform, PyTorch-Linear-like fan-in scale)."""
    ks = jax.random.split(key, 6)

    def lin(kw, kb, fan_in, fan_out):
        bound = 1.0 / float(fan_in) ** 0.5
        w = jax.random.uniform(kw, (fan_in, fan_out), jnp.float32, -bound, bound)
        b = jax.random.uniform(kb, (1, fan_out), jnp.float32, -bound, bound)
        return w, b

    w1, b1 = lin(ks[0], ks[1], input_size, hidden_size)
    w2, b2 = lin(ks[2], ks[3], hidden_size, hidden_size)
    w3, b3 = lin(ks[4], ks[5], hidden_size, action_size)
    return w1, b1, w2, b2, w3, b3


if __name__ == "__main__":
    # Small shapes consistent with the module: batch=2, state dim=16,
    # hidden=32, action dim=8.
    batch, input_size, hidden_size, action_size = 2, 16, 32, 8

    key = jax.random.PRNGKey(0)
    k_x, k_p, k_x2 = jax.random.split(key, 3)
    x = jax.random.normal(k_x, (batch, input_size), jnp.float32)
    params = init_params(k_p, input_size, hidden_size, action_size)
    w1, b1, w2, b2, w3, b3 = params

    # Reference in plain JAX (same math as the PyTorch forward).
    def ref_fwd(xv):
        h = jnp.tanh(xv @ w1 + b1)
        h = jnp.tanh(h @ w2 + b2)
        h = jnp.tanh(h @ w2 + b2)
        return jax.nn.softmax(h @ w3 + b3, axis=-1)

    ref = ref_fwd(x)

    # f32 matmul path (approx reciprocal -> ~1e-3 tolerance on probabilities).
    out_f32 = jax.block_until_ready(actor_forward(x, *params))
    assert out_f32.shape == (batch, action_size)
    assert jnp.allclose(out_f32, ref, atol=2e-3, rtol=2e-3), "f32 mismatch vs reference"
    assert jnp.allclose(jnp.sum(out_f32, axis=-1), 1.0, atol=2e-3), "rows must sum to ~1"

    # Ragged multi-tile batch: exercises cdiv grid + clipped last-tile writeback
    # (no padding of x, no output slice).
    x2 = jax.random.normal(k_x2, (50, input_size), jnp.float32)
    ref2 = ref_fwd(x2)
    out2 = jax.block_until_ready(actor_forward(x2, *params, block_batch=32))
    assert out2.shape == (50, action_size)
    assert jnp.allclose(out2, ref2, atol=2e-3, rtol=2e-3), "ragged-batch mismatch"

    # bf16 matmul-operand path (fast MXU path on v5e/v6e/v7x): loose tolerance.
    out_bf16 = jax.block_until_ready(
        actor_forward(x, *params, compute_dtype=jnp.bfloat16))
    assert jnp.allclose(out_bf16, ref, atol=3e-2, rtol=3e-2), "bf16 mismatch vs reference"
    assert jnp.allclose(jnp.sum(out_bf16, axis=-1), 1.0, atol=5e-3), "rows must sum to ~1"

    # TODO(synk): select_action's torch.multinomial sampling is host-side policy
    # logic and is intentionally not implemented in the kernel.
    print("KERNEL_OK")
</pallas_src>

<mosaic_0001>
module attributes {stable_mosaic.version = 11 : i64} {
  func.func @actor_kernel(%arg0: i32, %arg1: memref<8x16xf32, #tpu.memory_space<vmem>>, %arg2: memref<16x32xf32, #tpu.memory_space<vmem>>, %arg3: memref<1x32xf32, #tpu.memory_space<vmem>>, %arg4: memref<32x32xf32, #tpu.memory_space<vmem>>, %arg5: memref<1x32xf32, #tpu.memory_space<vmem>>, %arg6: memref<32x8xf32, #tpu.memory_space<vmem>>, %arg7: memref<1x8xf32, #tpu.memory_space<vmem>>, %arg8: memref<8x8xf32, #tpu.memory_space<vmem>>) attributes {dimension_semantics = [#tpu.dimension_semantics<parallel>], iteration_bounds = array<i64: 1>, scalar_prefetch = 0 : i64, scratch_operands = 0 : i64, tpu.core_type = #tpu.core_type<tc>, window_params = [{transform_indices = @transform_0, window_bounds = array<i64: 8, 16>}, {pipeline_mode = #tpu.pipeline_mode<synchronous>, transform_indices = @transform_1, window_bounds = array<i64: 16, 32>}, {pipeline_mode = #tpu.pipeline_mode<synchronous>, transform_indices = @transform_2, window_bounds = array<i64: 1, 32>}, {pipeline_mode = #tpu.pipeline_mode<synchronous>, transform_indices = @transform_3, window_bounds = array<i64: 32, 32>}, {pipeline_mode = #tpu.pipeline_mode<synchronous>, transform_indices = @transform_4, window_bounds = array<i64: 1, 32>}, {pipeline_mode = #tpu.pipeline_mode<synchronous>, transform_indices = @transform_5, window_bounds = array<i64: 32, 8>}, {pipeline_mode = #tpu.pipeline_mode<synchronous>, transform_indices = @transform_6, window_bounds = array<i64: 1, 8>}, {transform_indices = @transform_7, window_bounds = array<i64: 8, 8>}]} {
    %c0 = arith.constant 0 : index
    %c0_0 = arith.constant 0 : index
    %0 = vector.load %arg1[%c0, %c0_0] : memref<8x16xf32, #tpu.memory_space<vmem>>, vector<8x16xf32>
    %c0_1 = arith.constant 0 : index
    %c0_2 = arith.constant 0 : index
    %1 = vector.load %arg2[%c0_1, %c0_2] : memref<16x32xf32, #tpu.memory_space<vmem>>, vector<16x32xf32>
    %cst = arith.constant dense<0.000000e+00> : vector<8x32xf32>
    %2 = tpu.matmul %0, %1, %cst {dimension_numbers = #tpu.dot_dimension_numbers<[1], [0], [0], [1], [0, 0, 1, 1], [], []>} : vector<8x16xf32>, vector<16x32xf32>, vector<8x32xf32> -> vector<8x32xf32>
    %c0_3 = arith.constant 0 : index
    %c0_4 = arith.constant 0 : index
    %3 = vector.load %arg3[%c0_3, %c0_4] : memref<1x32xf32, #tpu.memory_space<vmem>>, vector<1x32xf32>
    %4 = vector.broadcast %3 : vector<1x32xf32> to vector<8x32xf32>
    %5 = arith.addf %2, %4 : vector<8x32xf32>
    %6 = math.tanh %5 : vector<8x32xf32>
    %c0_5 = arith.constant 0 : index
    %c0_6 = arith.constant 0 : index
    %7 = vector.load %arg4[%c0_5, %c0_6] : memref<32x32xf32, #tpu.memory_space<vmem>>, vector<32x32xf32>
    %cst_7 = arith.constant dense<0.000000e+00> : vector<8x32xf32>
    %8 = tpu.matmul %6, %7, %cst_7 {dimension_numbers = #tpu.dot_dimension_numbers<[1], [0], [0], [1], [0, 0, 1, 1], [], []>} : vector<8x32xf32>, vector<32x32xf32>, vector<8x32xf32> -> vector<8x32xf32>
    %c0_8 = arith.constant 0 : index
    %c0_9 = arith.constant 0 : index
    %9 = vector.load %arg5[%c0_8, %c0_9] : memref<1x32xf32, #tpu.memory_space<vmem>>, vector<1x32xf32>
    %10 = vector.broadcast %9 : vector<1x32xf32> to vector<8x32xf32>
    %11 = arith.addf %8, %10 : vector<8x32xf32>
    %12 = math.tanh %11 : vector<8x32xf32>
    %c0_10 = arith.constant 0 : index
    %c0_11 = arith.constant 0 : index
    %13 = vector.load %arg4[%c0_10, %c0_11] : memref<32x32xf32, #tpu.memory_space<vmem>>, vector<32x32xf32>
    %cst_12 = arith.constant dense<0.000000e+00> : vector<8x32xf32>
    %14 = tpu.matmul %12, %13, %cst_12 {dimension_numbers = #tpu.dot_dimension_numbers<[1], [0], [0], [1], [0, 0, 1, 1], [], []>} : vector<8x32xf32>, vector<32x32xf32>, vector<8x32xf32> -> vector<8x32xf32>
    %c0_13 = arith.constant 0 : index
    %c0_14 = arith.constant 0 : index
    %15 = vector.load %arg5[%c0_13, %c0_14] : memref<1x32xf32, #tpu.memory_space<vmem>>, vector<1x32xf32>
    %16 = vector.broadcast %15 : vector<1x32xf32> to vector<8x32xf32>
    %17 = arith.addf %14, %16 : vector<8x32xf32>
    %18 = math.tanh %17 : vector<8x32xf32>
    %c0_15 = arith.constant 0 : index
    %c0_16 = arith.constant 0 : index
    %19 = vector.load %arg6[%c0_15, %c0_16] : memref<32x8xf32, #tpu.memory_space<vmem>>, vector<32x8xf32>
    %cst_17 = arith.constant dense<0.000000e+00> : vector<8x8xf32>
    %20 = tpu.matmul %18, %19, %cst_17 {dimension_numbers = #tpu.dot_dimension_numbers<[1], [0], [0], [1], [0, 0, 1, 1], [], []>} : vector<8x32xf32>, vector<32x8xf32>, vector<8x8xf32> -> vector<8x8xf32>
    %c0_18 = arith.constant 0 : index
    %c0_19 = arith.constant 0 : index
    %21 = vector.load %arg7[%c0_18, %c0_19] : memref<1x8xf32, #tpu.memory_space<vmem>>, vector<1x8xf32>
    %22 = vector.broadcast %21 : vector<1x8xf32> to vector<8x8xf32>
    %23 = arith.addf %20, %22 : vector<8x8xf32>
    %cst_20 = arith.constant dense<0xFF800000> : vector<8xf32>
    %24 = vector.multi_reduction <maximumf>, %23, %cst_20 [1] : vector<8x8xf32> to vector<8xf32>
    %25 = vector.shape_cast %24 : vector<8xf32> to vector<8x1xf32>
    %26 = vector.broadcast %25 : vector<8x1xf32> to vector<8x8xf32>
    %27 = arith.subf %23, %26 : vector<8x8xf32>
    %28 = math.exp %27 : vector<8x8xf32>
    %cst_21 = arith.constant dense<0.000000e+00> : vector<8xf32>
    %29 = vector.multi_reduction <add>, %28, %cst_21 [1] : vector<8x8xf32> to vector<8xf32>
    %30 = vector.shape_cast %29 : vector<8xf32> to vector<8x1xf32>
    %31 = tpu.reciprocal %30 {approx = true} : vector<8x1xf32> -> vector<8x1xf32>
    %32 = vector.broadcast %31 : vector<8x1xf32> to vector<8x8xf32>
    %33 = arith.mulf %28, %32 : vector<8x8xf32>
    %c0_22 = arith.constant 0 : index
    %c0_23 = arith.constant 0 : index
    %34 = vector.load %arg8[%c0_22, %c0_23] : memref<8x8xf32, #tpu.memory_space<vmem>>, vector<8x8xf32>
    tpu.vector_store %arg8[%c0_22, %c0_23], %33 {strides = array<i32>} : memref<8x8xf32, #tpu.memory_space<vmem>>, vector<8x8xf32>,
    return
  }
  func.func @transform_0(%arg0: i32) -> (i32, i32) {
    %c0_i32 = arith.constant 0 : i32
    %c0_i32_0 = arith.constant 0 : i32
    return %arg0, %c0_i32 : i32, i32
  }
  func.func @transform_1(%arg0: i32) -> (i32, i32) {
    %c0_i32 = arith.constant 0 : i32
    %c0_i32_0 = arith.constant 0 : i32
    %c0_i32_1 = arith.constant 0 : i32
    return %c0_i32, %c0_i32_0 : i32, i32
  }
  func.func @transform_2(%arg0: i32) -> (i32, i32) {
    %c0_i32 = arith.constant 0 : i32
    %c0_i32_0 = arith.constant 0 : i32
    %c0_i32_1 = arith.constant 0 : i32
    return %c0_i32, %c0_i32_0 : i32, i32
  }
  func.func @transform_3(%arg0: i32) -> (i32, i32) {
    %c0_i32 = arith.constant 0 : i32
    %c0_i32_0 = arith.constant 0 : i32
    %c0_i32_1 = arith.constant 0 : i32
    return %c0_i32, %c0_i32_0 : i32, i32
  }
  func.func @transform_4(%arg0: i32) -> (i32, i32) {
    %c0_i32 = arith.constant 0 : i32
    %c0_i32_0 = arith.constant 0 : i32
    %c0_i32_1 = arith.constant 0 : i32
    return %c0_i32, %c0_i32_0 : i32, i32
  }
  func.func @transform_5(%arg0: i32) -> (i32, i32) {
    %c0_i32 = arith.constant 0 : i32
    %c0_i32_0 = arith.constant 0 : i32
    %c0_i32_1 = arith.constant 0 : i32
    return %c0_i32, %c0_i32_0 : i32, i32
  }
  func.func @transform_6(%arg0: i32) -> (i32, i32) {
    %c0_i32 = arith.constant 0 : i32
    %c0_i32_0 = arith.constant 0 : i32
    %c0_i32_1 = arith.constant 0 : i32
    return %c0_i32, %c0_i32_0 : i32, i32
  }
  func.func @transform_7(%arg0: i32) -> (i32, i32) {
    %c0_i32 = arith.constant 0 : i32
    %c0_i32_0 = arith.constant 0 : i32
    return %arg0, %c0_i32 : i32, i32
  }
}

</mosaic_0001>

<bundles_post_ra>
// kernel: tpu_custom_call.1
= control target key start
LH: loop header
LB: loop body
LE: loop exit
PB: predicated region body
PF: predicated region fallthrough
CT: control target
= control target key end

     0   :  { %12 = vsyncpa [#allocation3], 0  ;;  %s361_s0 = inlined_call_operand.vmem [shape: f32[2,16], index: 0, kind: input, shape index: {}]   ;;  %s362_s1 = inlined_call_operand.hbm [shape: f32[16,32], index: 1, kind: input, shape index: {}]   ;;  %s363_s2 = inlined_call_operand.vmem [shape: f32[1,32], index: 2, kind: input, shape index: {}]   ;;  %s364_s3 = inlined_call_operand.vmem [shape: f32[32,32], index: 3, kind: input, shape index: {}]   ;;  %s365_s4 = inlined_call_operand.vmem [shape: f32[1,32], index: 4, kind: input, shape index: {}]   ;;  %s366_s5 = inlined_call_operand.vmem [shape: f32[32,8], index: 5, kind: input, shape index: {}]   ;;  %s367_s6 = inlined_call_operand.vmem [shape: f32[1,8], index: 6, kind: input, shape index: {}]   ;;  %s368_s7 = inlined_call_operand.hbm [shape: f32[2,8], index: 7, kind: output, shape index: {}]  }
   0x1   :  { %13 = vsyncpa [#allocation4], 0  ;;  %s20_s26 = sshll.u32 %s362_s1, 4  ;;  %s270_s27 = smov [#allocation2]   ;;  %s21_s26 = int_to_ptr.hbm [resolvable:$true] %s20_s26 }
   0x2   :  { %s22_s28 = sshll.u32 %s270_s27, 4  ;;  %s271_s29 = smov 128   ;;  %s23_s28 = int_to_ptr.vmem [resolvable:$true] %s22_s28 }
   0x3   :  { %s272_s30 = smov 8  }
   0x4   :  { %28 = dma.hbm_to_vmem [thread:$0]  %s21_s26, 256, %s23_s28, [#allocation3], %s271_s29, %s271_s29, %s272_s30  }
   0x5   :  { %266 = dma.done.wait [#allocation3], 256  }
   0x6   :  { %267 = vsyncadd [#allocation3], 4294967040  ;;  %v45_v0 = vld [vmem:[#allocation2 + $0x8] sm:$0xff]  ;;  %v44_v1 = vld [vmem:[#allocation2] sm:$0xff]  ;;  %vm50_vm0 = vcmask 130048   ;;  %vm83_vm1 = vcmask 261120  }
   0x7   :  { %68 = vmatpush.msra.mxu0 %v45_v0  ;;  %v43_v2 = vld [vmem:[%s361_s0] sm:$0xff]  ;;  %v78_v3 = vld [vmem:[%s364_s3 + $0x18] sm:$0xff]  ;;  %v77_v4 = vld [vmem:[%s364_s3 + $0x10] sm:$0xff]  ;;  %vm163_vm2 = vcmask 64512  }
   0x8   :  { %99 = vmatpush.msra.mxu1 %v78_v3  ;;  %123 = vmatpush.msra.mxu2 %v78_v3  ;;  %v76_v5 = vld [vmem:[%s364_s3 + $0x8] sm:$0xff]  ;;  %v75_v6 = vld [vmem:[%s364_s3] sm:$0xff]  ;;  %v135_v15 = vld [vmem:[%s366_s5 + $0x18] sm:$0xff] }
   0x9   :  { %69 = vmatpush.msra.mxu0 %v44_v1  ;;  %v205_v7 = vld [vmem:[%s363_s2] ss:$0 sm:$0xff]  ;;  %155 = vmatpush.msra.mxu3 %v135_v15  ;;  %v134_v16 = vld [vmem:[%s366_s5 + $0x10] sm:$0xff]  ;;  %v133_v17 = vld [vmem:[%s366_s5 + $0x8] sm:$0xff] }
   0xa   :  { %195 = vmatmul.msk.f32.vlgmr.msra.gmra.mxu0 %vm50_vm0, %v43_v2  ;;  %100 = vmatpush.msra.mxu1 %v77_v4  ;;  %v206_v11 = vld [vmem:[%s365_s4] ss:$0 sm:$0xff] }
   0xb   :  { %124 = vmatpush.msra.mxu2 %v77_v4  ;;  %156 = vmatpush.msra.mxu3 %v134_v16  ;;  %v132_v18 = vld [vmem:[%s366_s5] sm:$0xff] }
   0xc   :  { %101 = vmatpush.msra.mxu1 %v76_v5  ;;  %v207_v22 = vld [vmem:[%s367_s6] ss:$0 sm:$0xff] }
   0xd   :  { %125 = vmatpush.msra.mxu2 %v76_v5  ;;  %157 = vmatpush.msra.mxu3 %v133_v17 }
   0xe   :  { %102 = vmatpush.msra.mxu1 %v75_v6 }
   0xf   :  { %126 = vmatpush.msra.mxu2 %v75_v6  ;;  %158 = vmatpush.msra.mxu3 %v132_v18 }
  0x87   :  { %v71_v8 = vpop.f32.mrf.mxu0 }
  0x88   :  { %v72_v9 = vadd.f32 %v205_v7, %v71_v8 }
  0x8a   :  { %208 = vtanh.f32 %v72_v9 }
  0x90   :  { %v209_v10 = vpop.eup %208 }
  0x91   :  { %196 = vmatmul.msk.f32.vlgmr.msra.gmra.mxu1 %vm83_vm1, %v209_v10 }
 0x10e   :  { %v104_v12 = vpop.f32.mrf.mxu1 }
 0x10f   :  { %v105_v13 = vadd.f32 %v206_v11, %v104_v12 }
 0x111   :  { %210 = vtanh.f32 %v105_v13 }
 0x117   :  { %v211_v14 = vpop.eup %210 }
 0x118   :  { %197 = vmatmul.msk.f32.vlgmr.msra.gmra.mxu2 %vm83_vm1, %v211_v14 }
 0x19b   :  { %v128_v19 = vpop.f32.mrf.mxu2 }
 0x19c   :  { %v129_v20 = vadd.f32 %v206_v11, %v128_v19 }
 0x19e   :  { %212 = vtanh.f32 %v129_v20 }
 0x1a4   :  { %v213_v21 = vpop.eup %212 }
 0x1a5   :  { %198 = vmatmul.msk.f32.vlgmr.msra.gmra.mxu3 %vm83_vm1, %v213_v21 }
 0x228   :  { %v160_v23 = vpop.f32.mrf.mxu3 }
 0x229   :  { %v161_v24 = vadd.f32 %v207_v22, %v160_v23 }
 0x22b   :  { %v164_v25 = vsel %vm163_vm2, %v161_v24, -inf }
 0x22c   :  { %165 = vmax.xlane.f32.xlu0 %v164_v25 }
 0x29f   :  { %v166_v26 = vpop.xlane.xlu0 %165 }
 0x2a0   :  { %v167_v27 = vsub.f32 %v161_v24, %v166_v26 }
 0x2a2   :  { %v168_v28 = vmul.f32 1.442695, %v167_v27 }
 0x2a4   :  { %214 = vpow2.f32 %v168_v28 }
 0x2aa   :  { %v215_v29 = vpop.eup %214 }
 0x2ab   :  { %v170_v30 = vsel %vm163_vm2, %v215_v29, 0.0 }
 0x2ac   :  { %171 = vadd.xlane.f32.xlu0 %v170_v30 }
 0x31f   :  { %v172_v31 = vpop.xlane.xlu0 %171 }
 0x320   :  { %216 = vrcp.f32 %v172_v31 }
 0x326   :  { %v217_v32 = vpop.eup %216 }
 0x327   :  { %v174_v33 = vmul.f32 %v217_v32, %v215_v29 }
 0x329   :  { %175 = vst.msk [vmem:[#allocation5] sm:$0xff] %vm163_vm2, %v174_v33 }
 0x32a   :  { %179 = vsyncadd [#allocation4], 96  ;;  %s182_s27 = sshll.u32 %s368_s7, 4  ;;  %s273_s28 = smov [#allocation5]   ;;  %s183_s27 = int_to_ptr.hbm [resolvable:$true] %s182_s27 }
 0x32b   :  { %s180_s29 = sshll.u32 %s273_s28, 4  ;;  %s274_s30 = smov 32   ;;  %s181_s29 = int_to_ptr.vmem [resolvable:$true] %s180_s29 }
 0x32c   :  { %s275_s8 = smov 2  }
 0x32d   :  { %188 = dma.vmem_to_hbm [thread:$0]  %s181_s29, 32, %s183_s27, [#allocation4], %s274_s30, %s274_s30, %s275_s8  }
 0x32e   :  { %268 = dma.done.wait [#allocation4], 128  }
 0x32f   :  { %269 = vsyncadd [#allocation4], 4294967168 }
 0x330   :  { %193 = vsyncpa [#allocation3], 1 }
 0x331   :  { %194 = vsyncpa [#allocation4], 1 }

</bundles_post_ra>
